<compile_context>
chip_gen: v6e
topology: v6e:2x2x1
jax: 0.10.0
libtpu: 0.0.40
codegen_flags: <defaults>
</compile_context>

<pallas_src>
import functools

import jax
import jax.numpy as jnp
from jax.experimental import pallas as pl
from jax.experimental.pallas import tpu as pltpu


def _round_up(a, b):
    return ((a + b - 1) // b) * b


def _distance_image_kernel(x_ref, img_ref, ws_ref, wi_ref, o_ref, *,
                           set_size, N, O):
    # x_ref:   (TILE_SETS*set_size, M)  flattened caption rows for this tile of sets
    # img_ref: (TILE_SETS, image_input) image features for the same sets
    # ws_ref:  (M, N*O)                 sentence projection (pre-transposed, resident)
    # wi_ref:  (image_input, N*O)       image projection   (pre-transposed, resident)
    # o_ref:   (TILE_SETS, O)           output rows for this tile of sets
    ts = o_ref.shape[0]
    NO = N * O

    # One big MXU matmul over the whole row tile; accumulate in f32.
    s_proj = jnp.dot(x_ref[...], ws_ref[...],
                     preferred_element_type=jnp.float32)            # (ts*set_size, NO)
    # Batched image projection for every set in the tile (single matmul).
    i_proj = jnp.dot(img_ref[...], wi_ref[...],
                     preferred_element_type=jnp.float32)            # (ts, NO)

    s3 = s_proj.reshape(ts, set_size, NO)
    # abs-diff once at full N*O width (VPU), broadcasting each set's image row.
    d = jnp.abs(s3 - i_proj[:, None, :])                            # (ts, set_size, NO)

    # Fold the n-groups: flat column k = n*O + o, matching torch .view(N, O).
    acc = d[..., 0:O]
    for n in range(1, N):
        acc = acc + d[..., n * O:(n + 1) * O]                       # (ts, set_size, O)

    # exp(-dist) then reduce over the set dimension; batched (ts, O) store.
    o_ref[...] = jnp.sum(jnp.exp(-acc), axis=1)                     # (ts, O)


def distance_image(x, image_features, w_sentences, w_image, *, N, O,
                   tile_sets=None, matmul_dtype=jnp.bfloat16):
    """Pallas forward for Distance_Image.

    x:              (nsets, set_size, M)  float32
    image_features: (nsets, image_input)  float32
    w_sentences:    (N*O, M)              torch Linear layout (out_features, in_features)
    w_image:        (N*O, image_input)
    returns:        (nsets, O)            float32
    """
    nsets, set_size, M = x.shape
    image_input = image_features.shape[1]
    NO = N * O
    assert w_sentences.shape == (NO, M)
    assert w_image.shape == (NO, image_input)

    # --- pick a set-tile so each grid step feeds the MXU a large row block -----------
    if tile_sets is None:
        target_rows = 1024                               # rows = tile_sets*set_size/step
        tile_sets = max(1, target_rows // max(1, set_size))
        # keep >= 2 grid steps when possible so v7x's two TensorCores both get work
        tile_sets = min(tile_sets, max(8, _round_up((nsets + 1) // 2, 8)))
    tile_sets = max(8, _round_up(tile_sets, 8))          # sublane-friendly block rows
    tile_sets = min(tile_sets, _round_up(nsets, 8))      # don't exceed (padded) nsets
    nsets_pad = _round_up(nsets, tile_sets)
    grid = (nsets_pad // tile_sets,)
    tile_rows = tile_sets * set_size
    # VMEM footprint per step is tiny here (~tile_rows*M*2B double-buffered plus the
    # resident weights); well under the 32 MiB scoped default on all generations.

    # --- wrapper-side glue: pad sets, flatten rows, cast matmul operands -------------
    x = jnp.asarray(x, jnp.float32)
    img = jnp.asarray(image_features, jnp.float32)
    if nsets_pad != nsets:
        x = jnp.pad(x, ((0, nsets_pad - nsets), (0, 0), (0, 0)))
        img = jnp.pad(img, ((0, nsets_pad - nsets), (0, 0)))
    x_flat = x.reshape(nsets_pad * set_size, M).astype(matmul_dtype)
    img = img.astype(matmul_dtype)
    ws_t = jnp.asarray(w_sentences, jnp.float32).T.astype(matmul_dtype)   # (M, N*O)
    wi_t = jnp.asarray(w_image, jnp.float32).T.astype(matmul_dtype)       # (ii, N*O)

    kernel = functools.partial(_distance_image_kernel,
                               set_size=set_size, N=N, O=O)

    itemsize = jnp.dtype(matmul_dtype).itemsize
    cost = pl.CostEstimate(
        flops=(2 * nsets_pad * set_size * M * NO          # sentence projection
               + 2 * nsets_pad * image_input * NO         # image projection
               + 3 * nsets_pad * set_size * NO),          # abs-diff + folds (approx)
        transcendentals=nsets_pad * set_size * O,         # exp
        bytes_accessed=((x_flat.size + img.size + ws_t.size + wi_t.size) * itemsize
                        + nsets_pad * O * 4),
    )

    out = pl.pallas_call(
        kernel,
        out_shape=jax.ShapeDtypeStruct((nsets_pad, O), jnp.float32),
        grid_spec=pltpu.PrefetchScalarGridSpec(
            num_scalar_prefetch=0,
            grid=grid,
            in_specs=[
                pl.BlockSpec((tile_rows, M), lambda j: (j, 0)),            # x rows, tile j
                pl.BlockSpec((tile_sets, image_input), lambda j: (j, 0)),  # image rows
                pl.BlockSpec((M, NO), lambda j: (0, 0)),                   # Ws^T resident
                pl.BlockSpec((image_input, NO), lambda j: (0, 0)),         # Wi^T resident
            ],
            out_specs=pl.BlockSpec((tile_sets, O), lambda j: (j, 0)),
        ),
        compiler_params=pltpu.CompilerParams(
            dimension_semantics=("parallel",)),
        cost_estimate=cost,
    )(x_flat, img, ws_t, wi_t)

    return out[:nsets]


def _reference(x, image_features, w_sentences, w_image, *, N, O, cast_dtype=None):
    """Pure-JAX reference mirroring the PyTorch forward.

    If cast_dtype is given, the inputs are rounded to that dtype first (to mirror the
    kernel's bf16 matmul operands) but all math runs in float32.
    """
    nsets, set_size, _ = x.shape
    xf = jnp.asarray(x, jnp.float32)
    imgf = jnp.asarray(image_features, jnp.float32)
    ws = jnp.asarray(w_sentences, jnp.float32)
    wi = jnp.asarray(w_image, jnp.float32)
    if cast_dtype is not None:
        xf = xf.astype(cast_dtype).astype(jnp.float32)
        imgf = imgf.astype(cast_dtype).astype(jnp.float32)
        ws = ws.astype(cast_dtype).astype(jnp.float32)
        wi = wi.astype(cast_dtype).astype(jnp.float32)
    hp = jax.lax.Precision.HIGHEST
    S = jnp.einsum("bsm,km->bsk", xf, ws, precision=hp).reshape(nsets, set_size, N, O)
    I = jnp.einsum("bi,ki->bk", imgf, wi, precision=hp).reshape(nsets, N, O)
    d = jnp.sum(jnp.abs(S - I[:, None, :, :]), axis=2)      # (nsets, set_size, O)
    return jnp.sum(jnp.exp(-d), axis=1)                     # (nsets, O)


if __name__ == "__main__":
    # Module hyper-parameters (small, consistent with the forward).
    M_dim = 32        # caption embedding size
    N = 4             # distance-kernel size
    O = 8             # number of distance kernels
    image_input = 16  # image feature size

    key = jax.random.PRNGKey(0)
    kx, kimg, kws, kwi = jax.random.split(key, 4)

    # Deterministic Linear weights (torch layout: (out_features, in_features)), no bias.
    w_sentences = 0.1 * jax.random.normal(kws, (N * O, M_dim), dtype=jnp.float32)
    w_image = 0.1 * jax.random.normal(kwi, (N * O, image_input), dtype=jnp.float32)

    # Two configs: one exercises multi-step grid + set padding, one the auto tile pick.
    for nsets, set_size, tile_sets in [(20, 8, 8), (64, 8, None)]:
        kx1 = jax.random.fold_in(kx, nsets)
        kimg1 = jax.random.fold_in(kimg, nsets)
        x = jax.random.normal(kx1, (nsets, set_size, M_dim), dtype=jnp.float32)
        image_features = jax.random.normal(kimg1, (nsets, image_input),
                                           dtype=jnp.float32)

        out = distance_image(x, image_features, w_sentences, w_image,
                             N=N, O=O, tile_sets=tile_sets)
        out = jax.block_until_ready(out)
        assert out.shape == (nsets, O)

        # Exact-math check against a reference using the same bf16 operand rounding.
        ref_bf16 = _reference(x, image_features, w_sentences, w_image,
                              N=N, O=O, cast_dtype=jnp.bfloat16)
        assert jnp.allclose(out, ref_bf16, rtol=1e-4, atol=1e-5), (out, ref_bf16)

        # Fidelity vs. the full-f32 PyTorch math: only bf16 input-rounding deviation.
        ref_f32 = _reference(x, image_features, w_sentences, w_image, N=N, O=O)
        assert jnp.allclose(out, ref_f32, rtol=5e-2, atol=1e-3), (out, ref_f32)

    print("KERNEL_OK")
</pallas_src>

<mosaic_0001>
module attributes {stable_mosaic.version = 11 : i64} {
  func.func @_distance_image_kernel(%arg0: i32, %arg1: memref<64x32xbf16, #tpu.memory_space<vmem>>, %arg2: memref<8x16xbf16, #tpu.memory_space<vmem>>, %arg3: memref<32x32xbf16, #tpu.memory_space<vmem>>, %arg4: memref<16x32xbf16, #tpu.memory_space<vmem>>, %arg5: memref<8x8xf32, #tpu.memory_space<vmem>>) attributes {dimension_semantics = [#tpu.dimension_semantics<parallel>], iteration_bounds = array<i64: 3>, scalar_prefetch = 0 : i64, scratch_operands = 0 : i64, tpu.core_type = #tpu.core_type<tc>, window_params = [{transform_indices = @transform_0, window_bounds = array<i64: 64, 32>}, {transform_indices = @transform_1, window_bounds = array<i64: 8, 16>}, {pipeline_mode = #tpu.pipeline_mode<synchronous>, transform_indices = @transform_2, window_bounds = array<i64: 32, 32>}, {pipeline_mode = #tpu.pipeline_mode<synchronous>, transform_indices = @transform_3, window_bounds = array<i64: 16, 32>}, {transform_indices = @transform_4, window_bounds = array<i64: 8, 8>}]} {
    %c0 = arith.constant 0 : index
    %c0_0 = arith.constant 0 : index
    %0 = vector.load %arg1[%c0, %c0_0] : memref<64x32xbf16, #tpu.memory_space<vmem>>, vector<64x32xbf16>
    %c0_1 = arith.constant 0 : index
    %c0_2 = arith.constant 0 : index
    %1 = vector.load %arg3[%c0_1, %c0_2] : memref<32x32xbf16, #tpu.memory_space<vmem>>, vector<32x32xbf16>
    %cst = arith.constant dense<0.000000e+00> : vector<64x32xf32>
    %2 = tpu.matmul %0, %1, %cst {dimension_numbers = #tpu.dot_dimension_numbers<[1], [0], [0], [1], [0, 0, 1, 1], [], []>} : vector<64x32xbf16>, vector<32x32xbf16>, vector<64x32xf32> -> vector<64x32xf32>
    %c0_3 = arith.constant 0 : index
    %c0_4 = arith.constant 0 : index
    %3 = vector.load %arg2[%c0_3, %c0_4] : memref<8x16xbf16, #tpu.memory_space<vmem>>, vector<8x16xbf16>
    %c0_5 = arith.constant 0 : index
    %c0_6 = arith.constant 0 : index
    %4 = vector.load %arg4[%c0_5, %c0_6] : memref<16x32xbf16, #tpu.memory_space<vmem>>, vector<16x32xbf16>
    %cst_7 = arith.constant dense<0.000000e+00> : vector<8x32xf32>
    %5 = tpu.matmul %3, %4, %cst_7 {dimension_numbers = #tpu.dot_dimension_numbers<[1], [0], [0], [1], [0, 0, 1, 1], [], []>} : vector<8x16xbf16>, vector<16x32xbf16>, vector<8x32xf32> -> vector<8x32xf32>
    %6 = vector.shape_cast %2 : vector<64x32xf32> to vector<8x8x32xf32>
    %7 = vector.shape_cast %5 : vector<8x32xf32> to vector<8x1x32xf32>
    %8 = vector.broadcast %7 : vector<8x1x32xf32> to vector<8x8x32xf32>
    %9 = arith.subf %6, %8 : vector<8x8x32xf32>
    %10 = math.absf %9 : vector<8x8x32xf32>
    %11 = vector.extract_strided_slice %10 {offsets = [0, 0, 0], sizes = [8, 8, 8], strides = [1, 1, 1]} : vector<8x8x32xf32> to vector<8x8x8xf32>
    %12 = vector.extract_strided_slice %10 {offsets = [0, 0, 8], sizes = [8, 8, 8], strides = [1, 1, 1]} : vector<8x8x32xf32> to vector<8x8x8xf32>
    %13 = arith.addf %11, %12 : vector<8x8x8xf32>
    %14 = vector.extract_strided_slice %10 {offsets = [0, 0, 16], sizes = [8, 8, 8], strides = [1, 1, 1]} : vector<8x8x32xf32> to vector<8x8x8xf32>
    %15 = arith.addf %13, %14 : vector<8x8x8xf32>
    %16 = vector.extract_strided_slice %10 {offsets = [0, 0, 24], sizes = [8, 8, 8], strides = [1, 1, 1]} : vector<8x8x32xf32> to vector<8x8x8xf32>
    %17 = arith.addf %15, %16 : vector<8x8x8xf32>
    %cst_8 = arith.constant 0.000000e+00 : f32
    %18 = vector.broadcast %cst_8 : f32 to vector<8x8x8xf32>
    %19 = arith.subf %18, %17 : vector<8x8x8xf32>
    %20 = math.exp %19 : vector<8x8x8xf32>
    %cst_9 = arith.constant dense<0.000000e+00> : vector<8x8xf32>
    %21 = vector.multi_reduction <add>, %20, %cst_9 [1] : vector<8x8x8xf32> to vector<8x8xf32>
    %c0_10 = arith.constant 0 : index
    %c0_11 = arith.constant 0 : index
    %22 = vector.load %arg5[%c0_10, %c0_11] : memref<8x8xf32, #tpu.memory_space<vmem>>, vector<8x8xf32>
    tpu.vector_store %arg5[%c0_10, %c0_11], %21 {strides = array<i32>} : memref<8x8xf32, #tpu.memory_space<vmem>>, vector<8x8xf32>,
    return
  }
  func.func @transform_0(%arg0: i32) -> (i32, i32) {
    %c0_i32 = arith.constant 0 : i32
    %c0_i32_0 = arith.constant 0 : i32
    return %arg0, %c0_i32 : i32, i32
  }
  func.func @transform_1(%arg0: i32) -> (i32, i32) {
    %c0_i32 = arith.constant 0 : i32
    %c0_i32_0 = arith.constant 0 : i32
    return %arg0, %c0_i32 : i32, i32
  }
  func.func @transform_2(%arg0: i32) -> (i32, i32) {
    %c0_i32 = arith.constant 0 : i32
    %c0_i32_0 = arith.constant 0 : i32
    %c0_i32_1 = arith.constant 0 : i32
    return %c0_i32, %c0_i32_0 : i32, i32
  }
  func.func @transform_3(%arg0: i32) -> (i32, i32) {
    %c0_i32 = arith.constant 0 : i32
    %c0_i32_0 = arith.constant 0 : i32
    %c0_i32_1 = arith.constant 0 : i32
    return %c0_i32, %c0_i32_0 : i32, i32
  }
  func.func @transform_4(%arg0: i32) -> (i32, i32) {
    %c0_i32 = arith.constant 0 : i32
    %c0_i32_0 = arith.constant 0 : i32
    return %arg0, %c0_i32 : i32, i32
  }
}

</mosaic_0001>

<bundles_post_ra>
// kernel: tpu_custom_call.1
= control target key start
LH: loop header
LB: loop body
LE: loop exit
PB: predicated region body
PF: predicated region fallthrough
CT: control target
= control target key end

     0   :  { %s896_s15 = smov 0   ;;  %s996_s0 = inlined_call_operand.vmem [shape: bf16[192,32], index: 0, kind: input, shape index: {}]   ;;  %s997_s1 = inlined_call_operand.vmem [shape: bf16[24,16], index: 1, kind: input, shape index: {}]   ;;  %s998_s2 = inlined_call_operand.vmem [shape: bf16[32,32], index: 2, kind: input, shape index: {}]   ;;  %s999_s3 = inlined_call_operand.vmem [shape: bf16[16,32], index: 3, kind: input, shape index: {}]   ;;  %s1000_s4 = inlined_call_operand.vmem [shape: f32[24,8], index: 4, kind: output, shape index: {}]  }
   0x1 LB: > { %s771_s16 = sadd.s32 4294967295, %s863_s15   ;;  %p775_p0 = scmp.ge.s32.totalorder %s863_s15, 1  ;;  %s863_s15 = sphi %s896_s15, %s14_s15  }
   0x2   : > { %p172_p1 = scmp.lt.s32.totalorder %s863_s15, 4 }
   0x4   : > { %p173_p2 = pnand %p775_p0, %p172_p1 }
   0x5   : > { %p207_p3 = scmp.lt.s32.totalorder (!%p173_p2), %s771_s16, 2  ;;  %s776_s23 = sshll.u32 (!%p173_p2), %s771_s16, 3 }
   0x6   : > { %176 = sbr.rel (%p173_p2) target bundleno = 416 (0x1a0), region = 36  ;;  %p202_p4 = scmp.lt.s32.totalorder (!%p173_p2), %s776_s23, 23 }
   0x7   : > { %s868_s6 = smov (!%p173_p2), 120   ;;  %s869_s7 = smov (!%p173_p2), 112  }
   0x8   : > { %s870_s8 = smov (!%p173_p2), 104  }
   0xb   : > { %v834_v0 = vld [vmem:[%s998_s2 + $0x8] sm:$0xff]   ;;  %v865_v1 = vmov 0.0   ;;  %v835_v2 = vld [vmem:[%s999_s3] sm:$0xff]   ;;  %vm866_vm0 = vmmov 0   ;;  %s1002_s16 = smov (!%p207_p3, %s771_s16), 2  ;;  %vm347_vm1 = vcmask 130048   ;;  %v396_v11 = vlaneseq }
   0xc   : > { %814 = vmatprep.subr.bf16.mxu1 %v865_v1  ;;  %802 = vmatprep.subr.bf16.mxu0 %v834_v0  ;;  %v836_v3 = vld [vmem:[%s998_s2] sm:$0xff]   ;;  %s778_s24 = sshll.u32 %s1002_s16, 2  ;;  %s1004_s23 = smov (!%p202_p4, %s776_s23), 23  ;;  %vm260_vm2 = vcmask 261120   ;;  %v867_v9 = vmov 1966171168  }
   0xd   : > { %816 = vmatprep.mubr.msk.bf16.mxu1 %vm866_vm0, %v865_v1  ;;  %803 = vmatpush3.bf16.msra.mxu0 %v834_v0  ;;  %s210_s27 = scalar_lea.vmem %s997_s1, %s778_s24  ;;  %s777_s28 = sshll.u32 %s1004_s23, 2  ;;  %v394_v10 = vunpack.c.l.s4 %v867_v9  ;;  %v397_v13 = vshrl.u32 %v396_v11, 7  ;;  %vm625_vm3 = vcmask 64512   ;;  %vm690_vm4 = vcmask 1041409  }
   0xe   : > { %815 = vmatpush3.bf16.msra.mxu1 %v835_v2  ;;  %804 = vmatprep.subr.bf16.mxu0 %v836_v3  ;;  %v338_v4 = vld [vmem:[%s210_s27] sm:$0xf]  ;;  %s205_s5 = scalar_lea.vmem %s996_s0, %s777_s28  ;;  %vm692_vm5 = vcmask 1042434   ;;  %vm694_vm6 = vcmask 1043459   ;;  %vm696_vm7 = vcmask 1044484   ;;  %vm698_vm8 = vcmask 1045509  }
   0xf   : > { %v837_v5 = vld [vmem:[%s205_s5] sm:$0xff]   ;;  %v838_v6 = vld [vmem:[%s205_s5 + $0x8] sm:$0xff]   ;;  %v839_v7 = vld [vmem:[%s205_s5 + $0x10] sm:$0xff]   ;;  %v395_v12 = vunpack.c.0.s8 %v394_v10  ;;  %v922_v17 = vsub.s32 0, %v397_v13  ;;  %s779_s9 = sshll.u32 %s1002_s16, 3  ;;  %vm700_vm9 = vcmask 1046534  }
  0x10   : > { %806 = vmatprep.mubr.msk.bf16.mxu0 %vm260_vm2, %v837_v5  ;;  %v840_v8 = vld [vmem:[%s205_s5 + $0x18] sm:$0xff]   ;;  %vm702_vm10 = vcmask 1047559   ;;  %s214_s12 = scalar_lea.vmem %s1000_s4, %s779_s9 }
  0x11   : > { %805 = vmatpush3.bf16.msra.mxu0 %v836_v3  ;;  %817 = vmatmul.mubr.msk.bf16.vlgmr.msra.gmra.mxu1 %vm347_vm1, %v338_v4  ;;  %v398_v14 = vsub.s32 %v395_v12, %v397_v13 }
  0x14   : > { %807 = vmatmul.mubr.msk.bf16.vlgmr.msra.gmra.mxu0 %vm260_vm2, %v838_v6 }
  0x15   : > { %810 = vmatprep.mubr.msk.bf16.mxu0 %vm260_vm2, %v839_v7 }
  0x1c   : > { %811 = vmatmul.mubr.msk.bf16.gmra.mxu0 %vm260_vm2, %v840_v8 }
  0xd1   : > { %v385_v15 = vpop.f32.mrf.mxu1 }
  0xd2   : > { %v399_v16 = vrot.slane %v385_v15, %v398_v14  ;;  %v392_v27 = vcombine.high %v385_v15, %v385_v15 }
  0xd3   : > { %v818_v18 = vpop.f32.mrf.mxu1 }
  0xd4   : > { %v407_v19 = vcombine.high %v399_v16, %v399_v16  ;;  %v415_v20 = vrot.slane %v399_v16, %v398_v14  ;;  %v808_v24 = vpop.f32.mrf.mxu0  ;;  %v406_v33 = vrot.slane %v392_v27, %v398_v14 }
  0xd5   : > { %v388_v21 = vpop.f32.mrf.mxu1 }
  0xd6   : > { %v429_v22 = vrot.slane %v407_v19, %v398_v14  ;;  %v437_v23 = vcombine.high %v415_v20, %v415_v20  ;;  %v444_v25 = vrot.slane %v415_v20, %v922_v17  ;;  %v307_v30 = vpop.f32.mrf.mxu0  ;;  %v422_v38 = vrot.slane %v406_v33, %v398_v14 }
  0xd7   : > { %v819_v26 = vpop.f32.mrf.mxu1  ;;  %v408_v48 = vcombine.high %v406_v33, %v406_v33 }
  0xd8   : > { %v452_v28 = vrot.slane %v437_v23, %v922_v17  ;;  %v439_v29 = vcombine.high %v429_v22, %v429_v22  ;;  %v481_v32 = vsub.f32 %v307_v30, %v444_v25  ;;  %v809_v37 = vpop.f32.mrf.mxu0  ;;  %v448_v40 = vrot.slane %v429_v22, %v922_v17 }
  0xd9   : > { %v438_v44 = vcombine.high %v422_v38, %v422_v38  ;;  %v436_v50 = vrot.slane %v408_v48, %v398_v14  ;;  %v460_v53 = vrot.slane %v422_v38, %v922_v17 }
  0xda   : > { %v483_v31 = vsub.f32 %v808_v24, %v452_v28  ;;  %v928_v35 = vand.u32 2147483647, %v481_v32  ;;  %v456_v36 = vrot.slane %v439_v29, %v922_v17  ;;  %v310_v41 = vpop.f32.mrf.mxu0 }
  0xdb   : > { %v482_v43 = vsub.f32 %v310_v41, %v448_v40  ;;  %v468_v46 = vrot.slane %v438_v44, %v922_v17  ;;  %v440_v54 = vcombine.high %v436_v50, %v436_v50  ;;  %v464_v61 = vrot.slane %v436_v50, %v922_v17 }
  0xdc   : > { %v926_v34 = vand.u32 2147483647, %v483_v31  ;;  %505 = vrot.lane.b32.xlu0 %v928_v35, %s868_s6  ;;  %v484_v39 = vsub.f32 %v809_v37, %v456_v36  ;;  %v812_v47 = vpop.f32.mrf.mxu0 }
  0xdd   : > { %v490_v45 = vand.u32 2147483647, %v482_v43  ;;  %v487_v49 = vsub.f32 %v812_v47, %v468_v46  ;;  %v472_v57 = vrot.slane %v440_v54, %v922_v17 }
  0xde   : > { %509 = vrot.lane.b32.xlu1 %v926_v34, %s868_s6  ;;  %v940_v42 = vand.u32 2147483647, %v484_v39  ;;  %v323_v52 = vpop.f32.mrf.mxu0 }
  0xdf   : > { %v953_v51 = vand.u32 2147483647, %v487_v49  ;;  %v485_v55 = vsub.f32 %v323_v52, %v460_v53 }
  0xe0   : > { %537 = vrot.lane.b32.xlu0 %v928_v35, %s869_s7  ;;  %v813_v56 = vpop.f32.mrf.mxu0 }
  0xe1   : > { %v493_v58 = vand.u32 2147483647, %v485_v55  ;;  %v488_v59 = vsub.f32 %v813_v56, %v472_v57 }
  0xe2   : > { %541 = vrot.lane.b32.xlu1 %v926_v34, %s869_s7  ;;  %v326_v60 = vpop.f32.mrf.mxu0 }
  0xe3   : > { %v496_v62 = vand.u32 2147483647, %v488_v59  ;;  %v486_v63 = vsub.f32 %v326_v60, %v464_v61 }
  0xe4   : > { %569 = vrot.lane.b32.xlu0 %v928_v35, %s870_s8 }
  0xe5   : > { %v494_v0 = vand.u32 2147483647, %v486_v63 }
  0xe6   : > { %511 = vrot.lane.b32.xlu1 %v940_v42, %s868_s6 }
  0xe8   : > { %573 = vrot.lane.b32.xlu0 %v926_v34, %s870_s8 }
  0xea   : > { %539 = vrot.lane.b32.xlu1 %v490_v45, %s869_s7 }
  0xec   : > { %507 = vrot.lane.b32.xlu0 %v490_v45, %s868_s6 }
  0xee   : > { %543 = vrot.lane.b32.xlu1 %v940_v42, %s869_s7 }
  0xf0   : > { %517 = vrot.lane.b32.xlu0 %v953_v51, %s868_s6 }
  0xf2   : > { %571 = vrot.lane.b32.xlu1 %v490_v45, %s870_s8 }
  0xf4   : > { %549 = vrot.lane.b32.xlu0 %v953_v51, %s869_s7 }
  0xf6   : > { %575 = vrot.lane.b32.xlu1 %v940_v42, %s870_s8 }
  0xf8   : > { %513 = vrot.lane.b32.xlu0 %v493_v58, %s868_s6 }
  0xfa   : > { %545 = vrot.lane.b32.xlu1 %v493_v58, %s869_s7 }
  0xfc   : > { %551 = vrot.lane.b32.xlu0 %v496_v62, %s869_s7 }
  0xfe   : > { %577 = vrot.lane.b32.xlu1 %v493_v58, %s870_s8 }
 0x100   : > { %515 = vrot.lane.b32.xlu0 %v494_v0, %s868_s6 }
 0x102   : > { %519 = vrot.lane.b32.xlu1 %v496_v62, %s868_s6 }
 0x104   : > { %547 = vrot.lane.b32.xlu0 %v494_v0, %s869_s7 }
 0x106   : > { %579 = vrot.lane.b32.xlu1 %v494_v0, %s870_s8 }
 0x108   : > { %581 = vrot.lane.b32.xlu0 %v953_v51, %s870_s8 }
 0x10a   : > { %583 = vrot.lane.b32.xlu1 %v496_v62, %s870_s8 }
 0x14e   : > { %v506_v1 = vpop.permute.xlu0 %505 }
 0x14f   : > { %v529_v7 = vadd.f32 %v506_v1, %v928_v35 }
 0x150   : > { %v510_v2 = vpop.permute.xlu1 %509 }
 0x151   : > { %v531_v11 = vadd.f32 %v510_v2, %v926_v34 }
 0x152   : > { %v538_v3 = vpop.permute.xlu0 %537 }
 0x153   : > { %v561_v10 = vadd.f32 %v538_v3, %v529_v7 }
 0x154   : > { %v542_v4 = vpop.permute.xlu1 %541 }
 0x155   : > { %v563_v16 = vadd.f32 %v542_v4, %v531_v11 }
 0x156   : > { %v570_v5 = vpop.permute.xlu0 %569 }
 0x157   : > { %v593_v12 = vadd.f32 %v570_v5, %v561_v10 }
 0x158   : > { %v512_v6 = vpop.permute.xlu1 %511 }
 0x159   : > { %v601_v18 = vsub.f32 0.0, %v593_v12  ;;  %v532_v22 = vadd.f32 %v512_v6, %v940_v42 }
 0x15a   : > { %v574_v8 = vpop.permute.xlu0 %573 }
 0x15b   : > { %v595_v19 = vadd.f32 %v574_v8, %v563_v16  ;;  %v609_v26 = vmul.f32 1.442695, %v601_v18 }
 0x15c   : > { %v540_v9 = vpop.permute.xlu1 %539 }
 0x15d   : > { %v603_v27 = vsub.f32 0.0, %v595_v19 }
 0x15e   : > { %v508_v13 = vpop.permute.xlu0 %507 }
 0x15f   : > { %v530_v15 = vadd.f32 %v508_v13, %v490_v45  ;;  %v613_v33 = vmul.f32 1.442695, %v603_v27 }
 0x160   : > { %v544_v14 = vpop.permute.xlu1 %543 }
 0x161   : > { %v562_v17 = vadd.f32 %v540_v9, %v530_v15  ;;  %v564_v24 = vadd.f32 %v544_v14, %v532_v22 }
 0x162   : > { %v518_v20 = vpop.permute.xlu0 %517 }
 0x163   : > { %v535_v53 = vadd.f32 %v518_v20, %v953_v51 }
 0x164   : > { %v572_v21 = vpop.permute.xlu1 %571 }
 0x165   : > { %v594_v23 = vadd.f32 %v572_v21, %v562_v17 }
 0x166   : > { %v550_v28 = vpop.permute.xlu0 %549 }
 0x167   : > { %v602_v25 = vsub.f32 0.0, %v594_v23  ;;  %v567_v56 = vadd.f32 %v550_v28, %v535_v53 }
 0x168   : > { %v576_v29 = vpop.permute.xlu1 %575 }
 0x169   : > { %v611_v30 = vmul.f32 1.442695, %v602_v25  ;;  %v596_v31 = vadd.f32 %v576_v29, %v564_v24 }
 0x16a   : > { %v514_v34 = vpop.permute.xlu0 %513 }
 0x16b   : > { %841 = vpow2.f32 %v611_v30  ;;  %v604_v32 = vsub.f32 0.0, %v596_v31  ;;  %v533_v37 = vadd.f32 %v514_v34, %v493_v58 }
 0x16c   : > { %843 = vpow2.f32 %v609_v26  ;;  %v546_v35 = vpop.permute.xlu1 %545 }
 0x16d   : > { %v615_v36 = vmul.f32 1.442695, %v604_v32  ;;  %v565_v38 = vadd.f32 %v546_v35, %v533_v37 }
 0x16e   : > { %v552_v39 = vpop.permute.xlu0 %551 }
 0x16f   : > { %845 = vpow2.f32 %v615_v36 }
 0x170   : > { %847 = vpow2.f32 %v613_v33  ;;  %v578_v40 = vpop.permute.xlu1 %577 }
 0x171   : > { %v597_v41 = vadd.f32 %v578_v40, %v565_v38 }
 0x172   : > { %v516_v43 = vpop.permute.xlu0 %515 }
 0x173   : > { %v605_v42 = vsub.f32 0.0, %v597_v41  ;;  %v534_v46 = vadd.f32 %v516_v43, %v494_v0 }
 0x174   : > { %v520_v44 = vpop.permute.xlu1 %519 }
 0x175   : > { %v617_v45 = vmul.f32 1.442695, %v605_v42  ;;  %v536_v47 = vadd.f32 %v520_v44, %v496_v62 }
 0x176   : > { %v548_v49 = vpop.permute.xlu0 %547 }
 0x177   : > { %849 = vpow2.f32 %v617_v45  ;;  %v566_v54 = vadd.f32 %v548_v49, %v534_v46  ;;  %v568_v58 = vadd.f32 %v552_v39, %v536_v47 }
 0x178   : > { %v842_v48 = vpop.eup %841  ;;  %v580_v50 = vpop.permute.xlu1 %579 }
 0x179   : > { %v844_v52 = vpop.eup %843  ;;  %v633_v55 = vsel %vm625_vm3, %v842_v48, 0.0  ;;  %v598_v57 = vadd.f32 %v580_v50, %v566_v54 }
 0x17a   : > { %v626_v60 = vsel %vm625_vm3, %v844_v52, 0.0  ;;  %v582_v61 = vpop.permute.xlu0 %581  ;;  %v634_v62 = vrot.slane %v633_v55, 4 }
 0x17b   : > { %v606_v1 = vsub.f32 0.0, %v598_v57  ;;  %v599_v2 = vadd.f32 %v582_v61, %v567_v56  ;;  %v627_v7 = vrot.slane %v626_v60, 4 }
 0x17c   : > { %v846_v59 = vpop.eup %845  ;;  %v584_v63 = vpop.permute.xlu1 %583  ;;  %v635_v9 = vadd.f32 %v634_v62, %v633_v55 }
 0x17d   : > { %v848_v0 = vpop.eup %847  ;;  %v600_v3 = vadd.f32 %v584_v63, %v568_v58  ;;  %v647_v4 = vsel %vm625_vm3, %v846_v59, 0.0  ;;  %v619_v5 = vmul.f32 1.442695, %v606_v1  ;;  %v607_v51 = vsub.f32 0.0, %v599_v2 }
 0x17e   : > { %v640_v8 = vsel %vm625_vm3, %v848_v0, 0.0  ;;  %v648_v12 = vrot.slane %v647_v4, 4  ;;  %v628_v15 = vadd.f32 %v627_v7, %v626_v60  ;;  %v636_v16 = vrot.slane %v635_v9, 2 }
 0x17f   : > { %v608_v6 = vsub.f32 0.0, %v600_v3  ;;  %851 = vpow2.f32 %v619_v5  ;;  %v621_v10 = vmul.f32 1.442695, %v607_v51  ;;  %v641_v13 = vrot.slane %v640_v8, 4 }
 0x180   : > { %v649_v18 = vadd.f32 %v648_v12, %v647_v4  ;;  %v629_v21 = vrot.slane %v628_v15, 2  ;;  %v637_v23 = vadd.f32 %v636_v16, %v635_v9 }
 0x181   : > { %v623_v11 = vmul.f32 1.442695, %v608_v6  ;;  %853 = vpow2.f32 %v621_v10  ;;  %v642_v20 = vadd.f32 %v641_v13, %v640_v8 }
 0x182   : > { %v650_v24 = vrot.slane %v649_v18, 2  ;;  %v630_v27 = vadd.f32 %v629_v21, %v628_v15  ;;  %v638_v28 = vrot.slane %v637_v23, 1 }
 0x183   : > { %855 = vpow2.f32 %v623_v11  ;;  %v643_v25 = vrot.slane %v642_v20, 2 }
 0x184   : > { %v850_v14 = vpop.eup %849  ;;  %v651_v30 = vadd.f32 %v650_v24, %v649_v18  ;;  %v631_v35 = vrot.slane %v630_v27, 1  ;;  %v639_v38 = vadd.f32 %v638_v28, %v637_v23 }
 0x185   : > { %v654_v17 = vsel %vm625_vm3, %v850_v14, 0.0  ;;  %v644_v31 = vadd.f32 %v643_v25, %v642_v20 }
 0x186   : > { %v655_v19 = vrot.slane %v654_v17, 4  ;;  %v652_v40 = vrot.slane %v651_v30, 1  ;;  %v632_v47 = vadd.f32 %v631_v35, %v630_v27 }
 0x187   : > { %v645_v44 = vrot.slane %v644_v31, 1 }
 0x188   : > { %v656_v22 = vadd.f32 %v655_v19, %v654_v17  ;;  %v691_v52 = vsel %vm690_vm4, %v639_v38, %v632_v47  ;;  %v653_v53 = vadd.f32 %v652_v40, %v651_v30 }
 0x189   : > { %v646_v56 = vadd.f32 %v645_v44, %v644_v31 }
 0x18a   : > { %v657_v26 = vrot.slane %v656_v22, 2 }
 0x18b   : > { %v693_v61 = vsel %vm692_vm5, %v646_v56, %v691_v52 }
 0x18c   : > { %v852_v29 = vpop.eup %851  ;;  %v658_v32 = vadd.f32 %v657_v26, %v656_v22  ;;  %v695_v0 = vsel %vm694_vm6, %v653_v53, %v693_v61 }
 0x18d   : > { %v661_v33 = vsel %vm625_vm3, %v852_v29, 0.0 }
 0x18e   : > { %v854_v34 = vpop.eup %853  ;;  %v662_v36 = vrot.slane %v661_v33, 4  ;;  %v659_v45 = vrot.slane %v658_v32, 1 }
 0x18f   : > { %v668_v39 = vsel %vm625_vm3, %v854_v34, 0.0 }
 0x190   : > { %v856_v37 = vpop.eup %855  ;;  %v663_v41 = vadd.f32 %v662_v36, %v661_v33  ;;  %v669_v42 = vrot.slane %v668_v39, 4  ;;  %v660_v57 = vadd.f32 %v659_v45, %v658_v32 }
 0x191   : > { %v675_v43 = vsel %vm625_vm3, %v856_v37, 0.0 }
 0x192   : > { %v676_v46 = vrot.slane %v675_v43, 4  ;;  %v664_v48 = vrot.slane %v663_v41, 2  ;;  %v670_v49 = vadd.f32 %v669_v42, %v668_v39  ;;  %v697_v2 = vsel %vm696_vm7, %v660_v57, %v695_v0 }
 0x194   : > { %v677_v50 = vadd.f32 %v676_v46, %v675_v43  ;;  %v665_v54 = vadd.f32 %v664_v48, %v663_v41  ;;  %v671_v55 = vrot.slane %v670_v49, 2 }
 0x196   : > { %v678_v58 = vrot.slane %v677_v50, 2  ;;  %v666_v59 = vrot.slane %v665_v54, 1  ;;  %v672_v60 = vadd.f32 %v671_v55, %v670_v49 }
 0x198   : > { %v679_v63 = vadd.f32 %v678_v58, %v677_v50  ;;  %v667_v62 = vadd.f32 %v666_v59, %v665_v54  ;;  %v673_v1 = vrot.slane %v672_v60, 1 }
 0x19a   : > { %v680_v3 = vrot.slane %v679_v63, 1  ;;  %v699_v4 = vsel %vm698_vm8, %v667_v62, %v697_v2  ;;  %v674_v5 = vadd.f32 %v673_v1, %v672_v60 }
 0x19c   : > { %v681_v51 = vadd.f32 %v680_v3, %v679_v63  ;;  %v701_v6 = vsel %vm700_vm9, %v674_v5, %v699_v4 }
 0x19e   : > { %v703_v7 = vsel %vm702_vm10, %v681_v51, %v701_v6 }
 0x19f   : > { %705 = vst.msk [vmem:[%s214_s12] sm:$0xff] %vm625_vm3, %v703_v7 }
 0x1a0 PF: > { %s14_s15 = sadd.s32 1, %s863_s15  }
 0x1a1   : > { %p11_p5 = scmp.ge.s32.totalorder %s14_s15, 5  }
 0x1a3   :  { %13 = sbr.rel (!%p11_p5) target bundleno = 1 (0x1), region = 69 }

</bundles_post_ra>
